<compile_context>
chip_gen: v5e
topology: v5e:2x2
jax: 0.10.0
libtpu: 0.0.40
codegen_flags: <defaults>
</compile_context>

<pallas_src>
import math

import jax
import jax.numpy as jnp
from jax.experimental import pallas as pl
from jax.experimental.pallas import tpu as pltpu


def _erf_f32(x):
    # Abramowitz & Stegun 7.1.26 rational approximation (max abs err ~1.5e-7).
    # Built only from exp / mul / add / where so it lowers cleanly in Mosaic
    # (VPU + EUP) without relying on an erf primitive lowering.
    a1 = 0.254829592
    a2 = -0.284496736
    a3 = 1.421413741
    a4 = -1.453152027
    a5 = 1.061405429
    p = 0.3275911
    ax = jnp.abs(x)
    t = 1.0 / (1.0 + p * ax)
    poly = ((((a5 * t + a4) * t + a3) * t + a2) * t + a1) * t
    y = 1.0 - poly * jnp.exp(-ax * ax)
    return jnp.where(x < 0.0, -y, y)


def _gelu_exact_f32(x):
    # PyTorch nn.GELU() default (approximate='none'): 0.5 * x * (1 + erf(x / sqrt(2)))
    return 0.5 * x * (1.0 + _erf_f32(x * (1.0 / math.sqrt(2.0))))


def mlp_kernel(x_ref, w_fc_ref, b_fc_ref, w_proj_ref, b_proj_ref, o_ref):
    # x_ref block: (bt, E) flattened tokens; weights/biases are resident full tiles.
    x = x_ref[...]
    h = jnp.dot(x, w_fc_ref[...], preferred_element_type=jnp.float32)
    h = h + b_fc_ref[...].astype(jnp.float32)                 # (bt, 4E), f32
    g = _gelu_exact_f32(h)                                    # GELU in f32 on VPU/EUP
    g = g.astype(w_proj_ref.dtype)                            # native-dtype 2nd matmul
    y = jnp.dot(g, w_proj_ref[...], preferred_element_type=jnp.float32)
    y = y + b_proj_ref[...].astype(jnp.float32)
    # TODO(synk): nn.Dropout(p) is identity in eval mode; training-time dropout not implemented.
    o_ref[...] = y.astype(o_ref.dtype)


def mlp_forward(x, w_fc, b_fc, w_proj, b_proj, *, block_t=256):
    """x: [N, S, E]; w_fc: [4E, E]; b_fc: [4E]; w_proj: [E, 4E]; b_proj: [E] (PyTorch layouts)."""
    N, S, E = x.shape
    H = w_fc.shape[0]
    T = N * S

    # Flatten batch*seq into one token axis -> single grid step at small sizes.
    x2 = x.reshape(T, E)
    bt = min(block_t, pl.cdiv(T, 8) * 8)          # token tile, sublane-aligned
    Tpad = pl.cdiv(T, bt) * bt
    if Tpad != T:
        x2 = jnp.pad(x2, ((0, Tpad - T), (0, 0)))

    out2 = pl.pallas_call(
        mlp_kernel,
        out_shape=jax.ShapeDtypeStruct((Tpad, E), x.dtype),
        grid_spec=pltpu.PrefetchScalarGridSpec(
            num_scalar_prefetch=0,
            grid=(Tpad // bt,),
            in_specs=[
                pl.BlockSpec((bt, E), lambda i: (i, 0)),    # tokens
                pl.BlockSpec((E, H), lambda i: (0, 0)),     # W_fc^T   [E, 4E]  (resident)
                pl.BlockSpec((1, H), lambda i: (0, 0)),     # b_fc     [1, 4E]  (resident)
                pl.BlockSpec((H, E), lambda i: (0, 0)),     # W_proj^T [4E, E]  (resident)
                pl.BlockSpec((1, E), lambda i: (0, 0)),     # b_proj   [1, E]   (resident)
            ],
            out_specs=pl.BlockSpec((bt, E), lambda i: (i, 0)),
        ),
        compiler_params=pltpu.CompilerParams(dimension_semantics=("parallel",)),
    )(x2, w_fc.T, b_fc.reshape(1, H), w_proj.T, b_proj.reshape(1, E))

    return out2[:T].reshape(N, S, E)


def _reference(x, w_fc, b_fc, w_proj, b_proj):
    # Pure-JAX reference of the PyTorch forward (eval mode, exact GELU).
    h = x @ w_fc.T + b_fc
    g = jax.nn.gelu(h, approximate=False)
    return g @ w_proj.T + b_proj


if __name__ == "__main__":
    # config: n_embed=32 (hidden 4*32=128), bias=True, dropout=0.0 (eval); batch=2, seq=8
    N, S, E = 2, 8, 32
    H = 4 * E
    key = jax.random.PRNGKey(0)
    kx, k1, k2, k3, k4 = jax.random.split(key, 5)

    x = jax.random.normal(kx, (N, S, E), dtype=jnp.float32)
    bound_fc = 1.0 / math.sqrt(E)    # PyTorch Linear default init range for c_fc
    w_fc = jax.random.uniform(k1, (H, E), minval=-bound_fc, maxval=bound_fc, dtype=jnp.float32)
    b_fc = jax.random.uniform(k2, (H,), minval=-bound_fc, maxval=bound_fc, dtype=jnp.float32)
    bound_pr = 1.0 / math.sqrt(H)    # for c_proj
    w_proj = jax.random.uniform(k3, (E, H), minval=-bound_pr, maxval=bound_pr, dtype=jnp.float32)
    b_proj = jax.random.uniform(k4, (E,), minval=-bound_pr, maxval=bound_pr, dtype=jnp.float32)

    out = mlp_forward(x, w_fc, b_fc, w_proj, b_proj)
    out = jax.block_until_ready(out)

    ref = _reference(x, w_fc, b_fc, w_proj, b_proj)
    assert out.shape == (N, S, E)
    assert bool(jnp.allclose(out, ref, atol=1e-4, rtol=1e-4)), float(jnp.max(jnp.abs(out - ref)))

    print("KERNEL_OK")
</pallas_src>

<mosaic_0001>
module attributes {stable_mosaic.version = 11 : i64} {
  func.func @mlp_kernel(%arg0: i32, %arg1: memref<16x32xf32, #tpu.memory_space<vmem>>, %arg2: memref<32x128xf32, #tpu.memory_space<vmem>>, %arg3: memref<1x128xf32, #tpu.memory_space<vmem>>, %arg4: memref<128x32xf32, #tpu.memory_space<vmem>>, %arg5: memref<1x32xf32, #tpu.memory_space<vmem>>, %arg6: memref<16x32xf32, #tpu.memory_space<vmem>>) attributes {dimension_semantics = [#tpu.dimension_semantics<parallel>], iteration_bounds = array<i64: 1>, scalar_prefetch = 0 : i64, scratch_operands = 0 : i64, tpu.core_type = #tpu.core_type<tc>, window_params = [{transform_indices = @transform_0, window_bounds = array<i64: 16, 32>}, {pipeline_mode = #tpu.pipeline_mode<synchronous>, transform_indices = @transform_1, window_bounds = array<i64: 32, 128>}, {pipeline_mode = #tpu.pipeline_mode<synchronous>, transform_indices = @transform_2, window_bounds = array<i64: 1, 128>}, {pipeline_mode = #tpu.pipeline_mode<synchronous>, transform_indices = @transform_3, window_bounds = array<i64: 128, 32>}, {pipeline_mode = #tpu.pipeline_mode<synchronous>, transform_indices = @transform_4, window_bounds = array<i64: 1, 32>}, {transform_indices = @transform_5, window_bounds = array<i64: 16, 32>}]} {
    %c0 = arith.constant 0 : index
    %c0_0 = arith.constant 0 : index
    %0 = vector.load %arg1[%c0, %c0_0] : memref<16x32xf32, #tpu.memory_space<vmem>>, vector<16x32xf32>
    %c0_1 = arith.constant 0 : index
    %c0_2 = arith.constant 0 : index
    %1 = vector.load %arg2[%c0_1, %c0_2] : memref<32x128xf32, #tpu.memory_space<vmem>>, vector<32x128xf32>
    %cst = arith.constant dense<0.000000e+00> : vector<16x128xf32>
    %2 = tpu.matmul %0, %1, %cst {dimension_numbers = #tpu.dot_dimension_numbers<[1], [0], [0], [1], [0, 0, 1, 1], [], []>} : vector<16x32xf32>, vector<32x128xf32>, vector<16x128xf32> -> vector<16x128xf32>
    %c0_3 = arith.constant 0 : index
    %c0_4 = arith.constant 0 : index
    %3 = vector.load %arg3[%c0_3, %c0_4] : memref<1x128xf32, #tpu.memory_space<vmem>>, vector<1x128xf32>
    %4 = vector.broadcast %3 : vector<1x128xf32> to vector<16x128xf32>
    %5 = arith.addf %2, %4 : vector<16x128xf32>
    %cst_5 = arith.constant 5.000000e-01 : f32
    %6 = vector.broadcast %cst_5 : f32 to vector<16x128xf32>
    %7 = arith.mulf %6, %5 : vector<16x128xf32>
    %cst_6 = arith.constant 0.707106769 : f32
    %8 = vector.broadcast %cst_6 : f32 to vector<16x128xf32>
    %9 = arith.mulf %5, %8 : vector<16x128xf32>
    %10 = math.absf %9 : vector<16x128xf32>
    %cst_7 = arith.constant 0.327591091 : f32
    %11 = vector.broadcast %cst_7 : f32 to vector<16x128xf32>
    %12 = arith.mulf %11, %10 : vector<16x128xf32>
    %cst_8 = arith.constant 1.000000e+00 : f32
    %13 = vector.broadcast %cst_8 : f32 to vector<16x128xf32>
    %14 = arith.addf %13, %12 : vector<16x128xf32>
    %cst_9 = arith.constant 1.000000e+00 : f32
    %15 = vector.broadcast %cst_9 : f32 to vector<16x128xf32>
    %16 = arith.divf %15, %14 : vector<16x128xf32>
    %cst_10 = arith.constant 1.06140542 : f32
    %17 = vector.broadcast %cst_10 : f32 to vector<16x128xf32>
    %18 = arith.mulf %17, %16 : vector<16x128xf32>
    %cst_11 = arith.constant -1.45315206 : f32
    %19 = vector.broadcast %cst_11 : f32 to vector<16x128xf32>
    %20 = arith.addf %18, %19 : vector<16x128xf32>
    %21 = arith.mulf %20, %16 : vector<16x128xf32>
    %cst_12 = arith.constant 1.42141378 : f32
    %22 = vector.broadcast %cst_12 : f32 to vector<16x128xf32>
    %23 = arith.addf %21, %22 : vector<16x128xf32>
    %24 = arith.mulf %23, %16 : vector<16x128xf32>
    %cst_13 = arith.constant -0.284496725 : f32
    %25 = vector.broadcast %cst_13 : f32 to vector<16x128xf32>
    %26 = arith.addf %24, %25 : vector<16x128xf32>
    %27 = arith.mulf %26, %16 : vector<16x128xf32>
    %cst_14 = arith.constant 0.254829586 : f32
    %28 = vector.broadcast %cst_14 : f32 to vector<16x128xf32>
    %29 = arith.addf %27, %28 : vector<16x128xf32>
    %30 = arith.mulf %29, %16 : vector<16x128xf32>
    %cst_15 = arith.constant 0.000000e+00 : f32
    %31 = vector.broadcast %cst_15 : f32 to vector<16x128xf32>
    %32 = arith.subf %31, %10 : vector<16x128xf32>
    %33 = arith.mulf %32, %10 : vector<16x128xf32>
    %34 = math.exp %33 : vector<16x128xf32>
    %35 = arith.mulf %30, %34 : vector<16x128xf32>
    %cst_16 = arith.constant 1.000000e+00 : f32
    %36 = vector.broadcast %cst_16 : f32 to vector<16x128xf32>
    %37 = arith.subf %36, %35 : vector<16x128xf32>
    %cst_17 = arith.constant 0.000000e+00 : f32
    %38 = vector.broadcast %cst_17 : f32 to vector<16x128xf32>
    %39 = arith.cmpf olt, %9, %38 : vector<16x128xf32>
    %cst_18 = arith.constant 0.000000e+00 : f32
    %40 = vector.broadcast %cst_18 : f32 to vector<16x128xf32>
    %41 = arith.subf %40, %37 : vector<16x128xf32>
    %42 = arith.select %39, %41, %37 : vector<16x128xi1>, vector<16x128xf32>
    %cst_19 = arith.constant 1.000000e+00 : f32
    %43 = vector.broadcast %cst_19 : f32 to vector<16x128xf32>
    %44 = arith.addf %43, %42 : vector<16x128xf32>
    %45 = arith.mulf %7, %44 : vector<16x128xf32>
    %c0_20 = arith.constant 0 : index
    %c0_21 = arith.constant 0 : index
    %46 = vector.load %arg4[%c0_20, %c0_21] : memref<128x32xf32, #tpu.memory_space<vmem>>, vector<128x32xf32>
    %cst_22 = arith.constant dense<0.000000e+00> : vector<16x32xf32>
    %47 = tpu.matmul %45, %46, %cst_22 {dimension_numbers = #tpu.dot_dimension_numbers<[1], [0], [0], [1], [0, 0, 1, 1], [], []>} : vector<16x128xf32>, vector<128x32xf32>, vector<16x32xf32> -> vector<16x32xf32>
    %c0_23 = arith.constant 0 : index
    %c0_24 = arith.constant 0 : index
    %48 = vector.load %arg5[%c0_23, %c0_24] : memref<1x32xf32, #tpu.memory_space<vmem>>, vector<1x32xf32>
    %49 = vector.broadcast %48 : vector<1x32xf32> to vector<16x32xf32>
    %50 = arith.addf %47, %49 : vector<16x32xf32>
    %c0_25 = arith.constant 0 : index
    %c0_26 = arith.constant 0 : index
    %51 = vector.load %arg6[%c0_25, %c0_26] : memref<16x32xf32, #tpu.memory_space<vmem>>, vector<16x32xf32>
    tpu.vector_store %arg6[%c0_25, %c0_26], %50 {strides = array<i32>} : memref<16x32xf32, #tpu.memory_space<vmem>>, vector<16x32xf32>,
    return
  }
  func.func @transform_0(%arg0: i32) -> (i32, i32) {
    %c0_i32 = arith.constant 0 : i32
    %c0_i32_0 = arith.constant 0 : i32
    return %arg0, %c0_i32 : i32, i32
  }
  func.func @transform_1(%arg0: i32) -> (i32, i32) {
    %c0_i32 = arith.constant 0 : i32
    %c0_i32_0 = arith.constant 0 : i32
    %c0_i32_1 = arith.constant 0 : i32
    return %c0_i32, %c0_i32_0 : i32, i32
  }
  func.func @transform_2(%arg0: i32) -> (i32, i32) {
    %c0_i32 = arith.constant 0 : i32
    %c0_i32_0 = arith.constant 0 : i32
    %c0_i32_1 = arith.constant 0 : i32
    return %c0_i32, %c0_i32_0 : i32, i32
  }
  func.func @transform_3(%arg0: i32) -> (i32, i32) {
    %c0_i32 = arith.constant 0 : i32
    %c0_i32_0 = arith.constant 0 : i32
    %c0_i32_1 = arith.constant 0 : i32
    return %c0_i32, %c0_i32_0 : i32, i32
  }
  func.func @transform_4(%arg0: i32) -> (i32, i32) {
    %c0_i32 = arith.constant 0 : i32
    %c0_i32_0 = arith.constant 0 : i32
    %c0_i32_1 = arith.constant 0 : i32
    return %c0_i32, %c0_i32_0 : i32, i32
  }
  func.func @transform_5(%arg0: i32) -> (i32, i32) {
    %c0_i32 = arith.constant 0 : i32
    %c0_i32_0 = arith.constant 0 : i32
    return %arg0, %c0_i32 : i32, i32
  }
}

</mosaic_0001>

<bundles_post_ra>
// kernel: tpu_custom_call.1
= control target key start
LH: loop header
LB: loop body
LE: loop exit
PB: predicated region body
PF: predicated region fallthrough
CT: control target
= control target key end

     0   :  { %s394_s0 = inlined_call_operand.vmem [shape: f32[16,32], index: 0, kind: input, shape index: {}]   ;;  %s395_s1 = inlined_call_operand.vmem [shape: f32[32,128], index: 1, kind: input, shape index: {}]   ;;  %s396_s2 = inlined_call_operand.vmem [shape: f32[1,128], index: 2, kind: input, shape index: {}]   ;;  %s397_s3 = inlined_call_operand.vmem [shape: f32[128,32], index: 3, kind: input, shape index: {}]   ;;  %s398_s4 = inlined_call_operand.vmem [shape: f32[1,32], index: 4, kind: input, shape index: {}]   ;;  %s399_s5 = inlined_call_operand.hbm [shape: f32[16,32], index: 5, kind: output, shape index: {}]  }
   0x1   :  { %v26_v0 = vld [vmem:[%s395_s1 + $0x18] sm:$0xff]  ;;  %v25_v1 = vld [vmem:[%s395_s1 + $0x10] sm:$0xff]  ;;  %v24_v2 = vld [vmem:[%s395_s1 + $0x8] sm:$0xff] }
   0x2   :  { %50 = vmatpush.msra.mxu0 %v26_v0 }
   0x4   :  { %51 = vmatpush.msra.mxu0 %v25_v1 }
   0x5   :  { %10 = vsyncpa [#allocation3], 0  ;;  %v23_v3 = vld [vmem:[%s395_s1] sm:$0xff]  ;;  %vm31_vm0 = vcmask 261120   ;;  %v22_v5 = vld [vmem:[%s394_s0 + $0x8] sm:$0xff]  ;;  %s192_s14 = sshll.u32 %s399_s5, 4  ;;  %s193_s14 = int_to_ptr.hbm [resolvable:$true] %s192_s14 }
   0x6   :  { %52 = vmatpush.msra.mxu0 %v24_v2  ;;  %v21_v4 = vld [vmem:[%s394_s0] sm:$0xff]  ;;  %v156_v6 = vld [vmem:[%s397_s3 + $0x78] sm:$0xff]  ;;  %v155_v7 = vld [vmem:[%s397_s3 + $0x70] sm:$0xff]  ;;  %s261_s0 = smov [#allocation2]   ;;  %s263_s15 = smov 8  }
   0x7   :  { %161 = vmatpush.msra.mxu1 %v156_v6  ;;  %206 = vmatpush.msra.mxu2 %v156_v6  ;;  %v225_v8 = vld [vmem:[%s396_s2] ss:$0 sm:$0xff]  ;;  %v154_v9 = vld [vmem:[%s397_s3 + $0x68] sm:$0xff]  ;;  %v152_v12 = vld [vmem:[%s397_s3 + $0x58] sm:$0xff]  ;;  %s190_s11 = sshll.u32 %s261_s0, 4  ;;  %s262_s2 = smov 128   ;;  %s191_s11 = int_to_ptr.vmem [resolvable:$true] %s190_s11 }
   0x8   :  { %53 = vmatpush.msra.mxu0 %v23_v3  ;;  %v153_v10 = vld [vmem:[%s397_s3 + $0x60] sm:$0xff]  ;;  %v151_v14 = vld [vmem:[%s397_s3 + $0x50] sm:$0xff]  ;;  %v150_v16 = vld [vmem:[%s397_s3 + $0x48] sm:$0xff] }
   0x9   :  { %204 = vmatmul.msk.f32.vlgmr.msra.gmra.mxu0 %vm31_vm0, %v21_v4  ;;  %162 = vmatpush.msra.mxu1 %v155_v7  ;;  %v149_v18 = vld [vmem:[%s397_s3 + $0x40] sm:$0xff]  ;;  %v148_v21 = vld [vmem:[%s397_s3 + $0x38] sm:$0xff]  ;;  %v147_v24 = vld [vmem:[%s397_s3 + $0x30] sm:$0xff] }
   0xa   :  { %207 = vmatpush.msra.mxu2 %v155_v7  ;;  %v146_v26 = vld [vmem:[%s397_s3 + $0x28] sm:$0xff]  ;;  %v145_v28 = vld [vmem:[%s397_s3 + $0x20] sm:$0xff]  ;;  %v144_v30 = vld [vmem:[%s397_s3 + $0x18] sm:$0xff] }
   0xb   :  { %163 = vmatpush.msra.mxu1 %v154_v9  ;;  %v143_v34 = vld [vmem:[%s397_s3 + $0x10] sm:$0xff]  ;;  %v142_v36 = vld [vmem:[%s397_s3 + $0x8] sm:$0xff]  ;;  %v141_v39 = vld [vmem:[%s397_s3] sm:$0xff] }
   0xc   :  { %208 = vmatpush.msra.mxu2 %v154_v9 }
   0xd   :  { %164 = vmatpush.msra.mxu1 %v153_v10 }
   0xe   :  { %209 = vmatpush.msra.mxu2 %v153_v10 }
   0xf   :  { %165 = vmatpush.msra.mxu1 %v152_v12 }
  0x10   :  { %210 = vmatpush.msra.mxu2 %v152_v12 }
  0x11   :  { %205 = vmatmul.msk.f32.gmra.mxu0 %vm31_vm0, %v22_v5  ;;  %166 = vmatpush.msra.mxu1 %v151_v14 }
  0x12   :  { %211 = vmatpush.msra.mxu2 %v151_v14 }
  0x13   :  { %167 = vmatpush.msra.mxu1 %v150_v16 }
  0x14   :  { %212 = vmatpush.msra.mxu2 %v150_v16 }
  0x15   :  { %168 = vmatpush.msra.mxu1 %v149_v18 }
  0x16   :  { %213 = vmatpush.msra.mxu2 %v149_v18 }
  0x17   :  { %169 = vmatpush.msra.mxu1 %v148_v21 }
  0x18   :  { %214 = vmatpush.msra.mxu2 %v148_v21 }
  0x19   :  { %170 = vmatpush.msra.mxu1 %v147_v24 }
  0x1a   :  { %215 = vmatpush.msra.mxu2 %v147_v24 }
  0x1b   :  { %171 = vmatpush.msra.mxu1 %v146_v26 }
  0x1c   :  { %216 = vmatpush.msra.mxu2 %v146_v26 }
  0x1d   :  { %172 = vmatpush.msra.mxu1 %v145_v28 }
  0x1e   :  { %217 = vmatpush.msra.mxu2 %v145_v28 }
  0x1f   :  { %173 = vmatpush.msra.mxu1 %v144_v30 }
  0x20   :  { %218 = vmatpush.msra.mxu2 %v144_v30 }
  0x21   :  { %174 = vmatpush.msra.mxu1 %v143_v34 }
  0x22   :  { %219 = vmatpush.msra.mxu2 %v143_v34 }
  0x23   :  { %175 = vmatpush.msra.mxu1 %v142_v36 }
  0x24   :  { %220 = vmatpush.msra.mxu2 %v142_v36 }
  0x25   :  { %176 = vmatpush.msra.mxu1 %v141_v39 }
  0x26   :  { %221 = vmatpush.msra.mxu2 %v141_v39 }
  0x86   :  { %v55_v11 = vpop.f32.mrf.mxu0 }
  0x87   :  { %v332_v13 = vadd.f32 %v225_v8, %v55_v11 }
  0x89   :  { %v338_v15 = vmul.f32 0.70710677, %v332_v13  ;;  %v61_v21 = vmul.f32 0.5, %v332_v13  ;;  %v226_v13 = vld [vmem:[%s398_s4] ss:$0 sm:$0xff] }
  0x8b   :  { %v344_v17 = vand.u32 2147483647, %v338_v15  ;;  %vm131_vm9 = vcmp.lt.f32.partialorder %v338_v15, 0.0 }
  0x8d   :  { %v67_v19 = vmul.f32 0.3275911, %v344_v17  ;;  %v119_v45 = vsub.f32 0.0, %v344_v17 }
  0x8e   :  { %v58_v20 = vpop.f32.mrf.mxu0 }
  0x8f   :  { %v69_v22 = vadd.f32 1.0, %v67_v19  ;;  %v353_v23 = vadd.f32 %v225_v8, %v58_v20  ;;  %v121_v52 = vmul.f32 %v119_v45, %v344_v17 }
  0x91   :  { %227 = vrcp.f32 %v69_v22  ;;  %v359_v25 = vmul.f32 0.70710677, %v353_v23  ;;  %v82_v37 = vand.u32 2147483648, %v69_v22  ;;  %v80_v40 = vand.u32 2147483647, %v69_v22 }
  0x92   :  { %vm76_vm2 = vweird.f32 %v69_v22  ;;  %v123_v59 = vmul.f32 1.442695, %v121_v52 }
  0x93   :  { %v66_v27 = vand.u32 2147483647, %v359_v25  ;;  %v83_v42 = vor.u32 1.1754944e-38, %v82_v37  ;;  %vm81_vm4 = vcmp.eq.f32.partialorder %v80_v40, 8.507059e+37  ;;  %vm132_vm10 = vcmp.lt.f32.partialorder %v359_v25, 0.0 }
  0x95   :  { %v68_v29 = vmul.f32 0.3275911, %v66_v27  ;;  %v120_v61 = vsub.f32 0.0, %v66_v27 }
  0x97   :  { %v228_v31 = vpop.eup %227  ;;  %v70_v33 = vadd.f32 1.0, %v68_v29  ;;  %v122_v3 = vmul.f32 %v120_v61, %v66_v27 }
  0x98   :  { %v72_v32 = vmul.f32 %v228_v31, %v69_v22  ;;  %vm77_vm1 = vweird.f32 %v228_v31 }
  0x99   :  { %229 = vrcp.f32 %v70_v33  ;;  %vm78_vm3 = vmor %vm76_vm2, %vm77_vm1  ;;  %v97_v51 = vand.u32 2147483648, %v70_v33  ;;  %v95_v54 = vand.u32 2147483647, %v70_v33  ;;  %vm91_vm6 = vweird.f32 %v70_v33 }
  0x9a   :  { %v73_v35 = vsub.f32 1.0, %v72_v32  ;;  %231 = vpow2.f32 %v123_v59  ;;  %v125_v8 = vmul.f32 1.442695, %v122_v3  ;;  %v62_v32 = vmul.f32 0.5, %v353_v23 }
  0x9b   :  { %v98_v58 = vor.u32 1.1754944e-38, %v97_v51  ;;  %vm96_vm8 = vcmp.eq.f32.partialorder %v95_v54, 8.507059e+37 }
  0x9c   :  { %v74_v38 = vmul.f32 %v228_v31, %v73_v35  ;;  %233 = vpow2.f32 %v125_v8 }
  0x9e   :  { %v75_v41 = vadd.f32 %v228_v31, %v74_v38 }
  0x9f   :  { %v230_v43 = vpop.eup %229 }
  0xa0   :  { %v79_v44 = vsel %vm78_vm3, %v228_v31, %v75_v41  ;;  %v87_v46 = vmul.f32 %v230_v43, %v70_v33  ;;  %vm92_vm5 = vweird.f32 %v230_v43  ;;  %v232_v10 = vpop.eup %231 }
  0xa1   :  { %v84_v47 = vsel %vm81_vm4, %v83_v42, %v79_v44  ;;  %vm93_vm7 = vmor %vm91_vm6, %vm92_vm5 }
  0xa2   :  { %v101_v48 = vmul.f32 1.0614054, %v84_v47  ;;  %v88_v49 = vsub.f32 1.0, %v87_v46  ;;  %v234_v26 = vpop.eup %233 }
  0xa4   :  { %v103_v50 = vadd.f32 -1.4531521, %v101_v48  ;;  %v89_v53 = vmul.f32 %v230_v43, %v88_v49 }
  0xa6   :  { %v105_v55 = vmul.f32 %v103_v50, %v84_v47  ;;  %v90_v56 = vadd.f32 %v230_v43, %v89_v53 }
  0xa8   :  { %v107_v57 = vadd.f32 1.4214138, %v105_v55  ;;  %v94_v60 = vsel %vm93_vm7, %v230_v43, %v90_v56 }
  0xa9   :  { %v99_v63 = vsel %vm96_vm8, %v98_v58, %v94_v60 }
  0xaa   :  { %v109_v62 = vmul.f32 %v107_v57, %v84_v47  ;;  %v102_v0 = vmul.f32 1.0614054, %v99_v63 }
  0xac   :  { %v111_v1 = vadd.f32 -0.28449672, %v109_v62  ;;  %v104_v2 = vadd.f32 -1.4531521, %v102_v0 }
  0xae   :  { %v113_v4 = vmul.f32 %v111_v1, %v84_v47  ;;  %v106_v5 = vmul.f32 %v104_v2, %v99_v63 }
  0xb0   :  { %v115_v6 = vadd.f32 0.2548296, %v113_v4  ;;  %v108_v7 = vadd.f32 1.4214138, %v106_v5 }
  0xb2   :  { %v117_v9 = vmul.f32 %v115_v6, %v84_v47  ;;  %v110_v11 = vmul.f32 %v108_v7, %v99_v63 }
  0xb4   :  { %v127_v12 = vmul.f32 %v232_v10, %v117_v9  ;;  %v112_v14 = vadd.f32 -0.28449672, %v110_v11 }
  0xb6   :  { %v129_v16 = vsub.f32 1.0, %v127_v12  ;;  %v114_v17 = vmul.f32 %v112_v14, %v99_v63 }
  0xb8   :  { %v133_v18 = vsub.f32 0.0, %v129_v16  ;;  %v116_v19 = vadd.f32 0.2548296, %v114_v17 }
  0xba   :  { %v135_v20 = vsel %vm131_vm9, %v133_v18, %v129_v16  ;;  %v118_v24 = vmul.f32 %v116_v19, %v99_v63 }
  0xbb   :  { %v137_v22 = vadd.f32 1.0, %v135_v20 }
  0xbc   :  { %v128_v28 = vmul.f32 %v234_v26, %v118_v24 }
  0xbd   :  { %v139_v27 = vmul.f32 %v137_v22, %v61_v21 }
  0xbe   :  { %v130_v29 = vsub.f32 1.0, %v128_v28 }
  0xbf   :  { %177 = vmatmul.f32.vlgmr.msra.gmra.mxu1 %v139_v27 }
  0xc0   :  { %v134_v30 = vsub.f32 0.0, %v130_v29 }
  0xc2   :  { %v136_v31 = vsel %vm132_vm10, %v134_v30, %v130_v29 }
  0xc3   :  { %v138_v33 = vadd.f32 1.0, %v136_v31 }
  0xc5   :  { %v140_v34 = vmul.f32 %v138_v33, %v62_v32 }
  0xc7   :  { %180 = vmatmul.f32.vlgmr.msra.gmra.mxu2 %v140_v34 }
 0x13c   :  { %v178_v15 = vpop.f32.mrf.mxu1 }
 0x13d   :  { %v179_v35 = vadd.f32 %v226_v13, %v178_v15 }
 0x13f   :  { %184 = vst.msk [vmem:[#allocation2] sm:$0xff] %vm31_vm0, %v179_v35 }
 0x14a   :  { %v181_v25 = vpop.f32.mrf.mxu2 }
 0x14b   :  { %v182_v23 = vadd.f32 %v226_v13, %v181_v25 }
 0x14d   :  { %185 = vst.msk [vmem:[#allocation2 + $0x8] sm:$0xff] %vm31_vm0, %v182_v23 }
 0x14e   :  { %198 = dma.vmem_to_hbm [thread:$0]  %s191_s11, 256, %s193_s14, [#allocation3], %s262_s2, %s262_s2, %s263_s15  }
 0x14f   :  { %259 = dma.done.wait [#allocation3], 256  }
 0x150   :  { %260 = vsyncadd [#allocation3], 4294967040 }
 0x151   :  { %203 = vsyncpa [#allocation3], 1 }

</bundles_post_ra>
